<compile_context>
chip_gen: v7x
topology: tpu7x:2x2x1
jax: 0.10.0
libtpu: 0.0.40
codegen_flags: <defaults>
</compile_context>

<pallas_src>
import jax
import jax.numpy as jnp
from jax.experimental import pallas as pl
from jax.experimental.pallas import tpu as pltpu

IN_DIM = 2
HIDDEN = 200
HP = 256          # hidden padded to a clean MXU / vreg tile
OUT_DIM = 1


def _round_up(x, m):
    return ((x + m - 1) // m) * m


def _choose_tb(batch, tb_max=4096):
    # Large tiles amortize per-grid-step overhead; aim for >=2 tiles on big batches so both
    # v7x TensorCores can get work. Lane tiles must be multiples of 128.
    half = _round_up(max(1, (batch + 1) // 2), 128)
    return max(128, min(tb_max, half))


def hnn_kernel(y_ref, w1c0_ref, w1c1_ref, b1_ref, w2t_ref, b2_ref, w3c_ref,
               o_ref, h1_ref):
    # y_ref:    (2, TB)    batch on lanes
    # w1c0_ref: (HP, 1)    layer-1 weight column for y[:,0]  (rows 200: zero)
    # w1c1_ref: (HP, 1)    layer-1 weight column for y[:,1]
    # b1_ref:   (HP, 1)
    # w2t_ref:  (HP, HP)   transposed layer-2 weight (rows/cols 200: zero)
    # b2_ref:   (HP, 1)
    # w3c_ref:  (HP, 1)    layer-3 weight as a column (rows 200: zero)
    # o_ref:    (1, TB)    lane-dense output
    # h1_ref:   (HP, TB)   VMEM scratch holding the padded layer-1 activation
    tb = h1_ref.shape[1]
    y0 = y_ref[0:1, :]                                    # (1, TB)
    y1 = y_ref[1:2, :]                                    # (1, TB)

    # Layer 1 (K=2): two VPU broadcast FMAs + tanh, restricted to the 200 valid rows.
    h1_ref[0:HIDDEN, :] = jnp.tanh(
        w1c0_ref[0:HIDDEN, :] * y0
        + w1c1_ref[0:HIDDEN, :] * y1
        + b1_ref[0:HIDDEN, :]
    )
    # Zero the 56 padded rows so the K=256 contraction never reads stale/NaN VMEM.
    h1_ref[HIDDEN:, :] = jnp.zeros((HP - HIDDEN, tb), jnp.float32)

    # Layer 2: full (256,256) @ (256,TB) f32 MXU matmul; bias + tanh only on valid rows.
    z2 = jnp.dot(w2t_ref[...], h1_ref[...], preferred_element_type=jnp.float32)   # (HP, TB)
    h2 = jnp.tanh(z2[0:HIDDEN, :] + b2_ref[0:HIDDEN, :])                           # (200, TB)

    # Layer 3 (M=1, no bias): VPU multiply + XLU sublane reduce instead of an MXU matmul.
    o_ref[...] = jnp.sum(w3c_ref[0:HIDDEN, :] * h2, axis=0, keepdims=True)         # (1, TB)


def prepare_hnn_params(w1, b1, w2, b2, w3):
    """One-time prep (hoisted out of the hot path): transpose + zero-pad HIDDEN -> HP.
    Weights are in (in_features, out_features) layout, biases (1, out_features), i.e. the
    forward is y @ w + b, matching the PyTorch module."""
    w1c0 = jnp.zeros((HP, 1), jnp.float32).at[:HIDDEN, 0].set(w1[0, :])
    w1c1 = jnp.zeros((HP, 1), jnp.float32).at[:HIDDEN, 0].set(w1[1, :])
    b1c = jnp.zeros((HP, 1), jnp.float32).at[:HIDDEN, :].set(b1.reshape(HIDDEN, 1))
    w2t = jnp.zeros((HP, HP), jnp.float32).at[:HIDDEN, :HIDDEN].set(w2.T)
    b2c = jnp.zeros((HP, 1), jnp.float32).at[:HIDDEN, :].set(b2.reshape(HIDDEN, 1))
    w3c = jnp.zeros((HP, 1), jnp.float32).at[:HIDDEN, :].set(w3.reshape(HIDDEN, 1))
    return w1c0, w1c1, b1c, w2t, b2c, w3c


def hnn_forward(y, params, *, tb=None):
    """Forward pass. y: (B, 2); params from prepare_hnn_params(). Returns (B, 1)."""
    w1c0, w1c1, b1c, w2t, b2c, w3c = params
    B = y.shape[0]
    if tb is None:
        tb = _choose_tb(B)
    Bp = _round_up(B, tb)

    # Only per-call prep: batch-on-lanes transpose + zero-pad of y.
    y_t = jnp.zeros((IN_DIM, Bp), jnp.float32).at[:, :B].set(y.T.astype(jnp.float32))

    grid = (Bp // tb,)
    const = lambda i: (0, 0)                     # weights/biases stay VMEM-resident

    flops = 2 * HP * HP * Bp + 2 * IN_DIM * HIDDEN * Bp + 2 * HIDDEN * Bp
    bytes_accessed = 4 * ((IN_DIM + OUT_DIM) * Bp + HP * HP + 5 * HP)

    out = pl.pallas_call(
        hnn_kernel,
        out_shape=jax.ShapeDtypeStruct((OUT_DIM, Bp), jnp.float32),
        grid_spec=pltpu.PrefetchScalarGridSpec(
            num_scalar_prefetch=0,
            grid=grid,
            in_specs=[
                pl.BlockSpec((IN_DIM, tb), lambda i: (0, i)),   # y tile (batch on lanes)
                pl.BlockSpec((HP, 1), const),                   # w1 column 0
                pl.BlockSpec((HP, 1), const),                   # w1 column 1
                pl.BlockSpec((HP, 1), const),                   # b1
                pl.BlockSpec((HP, HP), const),                  # w2^T
                pl.BlockSpec((HP, 1), const),                   # b2
                pl.BlockSpec((HP, 1), const),                   # w3 column
            ],
            out_specs=pl.BlockSpec((OUT_DIM, tb), lambda i: (0, i)),
            scratch_shapes=[pltpu.VMEM((HP, tb), jnp.float32)],
        ),
        compiler_params=pltpu.CompilerParams(
            dimension_semantics=("parallel",),       # batch tiles can shard across TCs on v7x
            vmem_limit_bytes=32 * 1024 * 1024,       # lets tb=4096 fit v5e's 16 MiB default
        ),
        cost_estimate=pl.CostEstimate(
            flops=flops,
            transcendentals=2 * HIDDEN * Bp,
            bytes_accessed=bytes_accessed,
        ),
    )(y_t, w1c0, w1c1, b1c, w2t, b2c, w3c)

    return out[:, :B].T                              # back to (B, 1)


def init_params(key):
    # Deterministic synthetic init mirroring nn.init.normal_(weight, std=0.1);
    # biases get small deterministic normals (exact values irrelevant — synthetic weights).
    k1, k2, k3, kb1, kb2 = jax.random.split(key, 5)
    w1 = 0.1 * jax.random.normal(k1, (IN_DIM, HIDDEN), jnp.float32)
    w2 = 0.1 * jax.random.normal(k2, (HIDDEN, HIDDEN), jnp.float32)
    w3 = 0.1 * jax.random.normal(k3, (HIDDEN, OUT_DIM), jnp.float32)
    b1 = 0.1 * jax.random.normal(kb1, (1, HIDDEN), jnp.float32)
    b2 = 0.1 * jax.random.normal(kb2, (1, HIDDEN), jnp.float32)
    return w1, b1, w2, b2, w3


if __name__ == "__main__":
    key = jax.random.PRNGKey(0)
    kx, kp = jax.random.split(key)

    B = 8
    y = jax.random.normal(kx, (B, IN_DIM), jnp.float32)   # (batch, 2) = (q, p)
    w1, b1, w2, b2, w3 = init_params(kp)

    params = prepare_hnn_params(w1, b1, w2, b2, w3)        # one-time; weights fixed across calls
    out = hnn_forward(y, params)
    out = jax.block_until_ready(out)

    # Sanity check against pure-JAX reference of the same forward.
    ref = jnp.tanh(y @ w1 + b1)
    ref = jnp.tanh(ref @ w2 + b2)
    ref = ref @ w3
    assert out.shape == (B, OUT_DIM)
    assert jnp.allclose(out, ref, atol=1e-5, rtol=1e-4)

    print("KERNEL_OK")
</pallas_src>

<mosaic_0001>
module attributes {stable_mosaic.version = 11 : i64} {
  func.func @hnn_kernel(%arg0: i32, %arg1: memref<2x128xf32, #tpu.memory_space<vmem>>, %arg2: memref<256x1xf32, #tpu.memory_space<vmem>>, %arg3: memref<256x1xf32, #tpu.memory_space<vmem>>, %arg4: memref<256x1xf32, #tpu.memory_space<vmem>>, %arg5: memref<256x256xf32, #tpu.memory_space<vmem>>, %arg6: memref<256x1xf32, #tpu.memory_space<vmem>>, %arg7: memref<256x1xf32, #tpu.memory_space<vmem>>, %arg8: memref<1x128xf32, #tpu.memory_space<vmem>>, %arg9: memref<256x128xf32, #tpu.memory_space<vmem>>) attributes {dimension_semantics = [#tpu.dimension_semantics<parallel>], iteration_bounds = array<i64: 1>, scalar_prefetch = 0 : i64, scratch_operands = 1 : i64, tpu.core_type = #tpu.core_type<tc>, window_params = [{transform_indices = @transform_0, window_bounds = array<i64: 2, 128>}, {pipeline_mode = #tpu.pipeline_mode<synchronous>, transform_indices = @transform_1, window_bounds = array<i64: 256, 1>}, {pipeline_mode = #tpu.pipeline_mode<synchronous>, transform_indices = @transform_2, window_bounds = array<i64: 256, 1>}, {pipeline_mode = #tpu.pipeline_mode<synchronous>, transform_indices = @transform_3, window_bounds = array<i64: 256, 1>}, {pipeline_mode = #tpu.pipeline_mode<synchronous>, transform_indices = @transform_4, window_bounds = array<i64: 256, 256>}, {pipeline_mode = #tpu.pipeline_mode<synchronous>, transform_indices = @transform_5, window_bounds = array<i64: 256, 1>}, {pipeline_mode = #tpu.pipeline_mode<synchronous>, transform_indices = @transform_6, window_bounds = array<i64: 256, 1>}, {transform_indices = @transform_7, window_bounds = array<i64: 1, 128>}]} {
    %c0 = arith.constant 0 : index
    %c0_0 = arith.constant 0 : index
    %0 = vector.load %arg1[%c0, %c0_0] : memref<2x128xf32, #tpu.memory_space<vmem>>, vector<1x128xf32>
    %c1 = arith.constant 1 : index
    %c0_1 = arith.constant 0 : index
    %1 = vector.load %arg1[%c1, %c0_1] : memref<2x128xf32, #tpu.memory_space<vmem>>, vector<1x128xf32>
    %c0_2 = arith.constant 0 : index
    %c0_3 = arith.constant 0 : index
    %2 = vector.load %arg2[%c0_2, %c0_3] : memref<256x1xf32, #tpu.memory_space<vmem>>, vector<200x1xf32>
    %3 = vector.broadcast %2 : vector<200x1xf32> to vector<200x128xf32>
    %4 = vector.broadcast %0 : vector<1x128xf32> to vector<200x128xf32>
    %5 = arith.mulf %3, %4 : vector<200x128xf32>
    %c0_4 = arith.constant 0 : index
    %c0_5 = arith.constant 0 : index
    %6 = vector.load %arg3[%c0_4, %c0_5] : memref<256x1xf32, #tpu.memory_space<vmem>>, vector<200x1xf32>
    %7 = vector.broadcast %6 : vector<200x1xf32> to vector<200x128xf32>
    %8 = vector.broadcast %1 : vector<1x128xf32> to vector<200x128xf32>
    %9 = arith.mulf %7, %8 : vector<200x128xf32>
    %10 = arith.addf %5, %9 : vector<200x128xf32>
    %c0_6 = arith.constant 0 : index
    %c0_7 = arith.constant 0 : index
    %11 = vector.load %arg4[%c0_6, %c0_7] : memref<256x1xf32, #tpu.memory_space<vmem>>, vector<200x1xf32>
    %12 = vector.broadcast %11 : vector<200x1xf32> to vector<200x128xf32>
    %13 = arith.addf %10, %12 : vector<200x128xf32>
    %14 = math.tanh %13 : vector<200x128xf32>
    %c0_8 = arith.constant 0 : index
    %c0_9 = arith.constant 0 : index
    %15 = vector.load %arg9[%c0_8, %c0_9] : memref<256x128xf32, #tpu.memory_space<vmem>>, vector<200x128xf32>
    tpu.vector_store %arg9[%c0_8, %c0_9], %14 {strides = array<i32>} : memref<256x128xf32, #tpu.memory_space<vmem>>, vector<200x128xf32>,
    %cst = arith.constant 0.000000e+00 : f32
    %16 = vector.broadcast %cst : f32 to vector<56x128xf32>
    %c200 = arith.constant 200 : index
    %c0_10 = arith.constant 0 : index
    %17 = vector.load %arg9[%c200, %c0_10] : memref<256x128xf32, #tpu.memory_space<vmem>>, vector<56x128xf32>
    tpu.vector_store %arg9[%c200, %c0_10], %16 {strides = array<i32>} : memref<256x128xf32, #tpu.memory_space<vmem>>, vector<56x128xf32>,
    %c0_11 = arith.constant 0 : index
    %c0_12 = arith.constant 0 : index
    %18 = vector.load %arg5[%c0_11, %c0_12] : memref<256x256xf32, #tpu.memory_space<vmem>>, vector<256x256xf32>
    %c0_13 = arith.constant 0 : index
    %c0_14 = arith.constant 0 : index
    %19 = vector.load %arg9[%c0_13, %c0_14] : memref<256x128xf32, #tpu.memory_space<vmem>>, vector<256x128xf32>
    %cst_15 = arith.constant dense<0.000000e+00> : vector<256x128xf32>
    %20 = tpu.matmul %18, %19, %cst_15 {dimension_numbers = #tpu.dot_dimension_numbers<[1], [0], [0], [1], [0, 0, 1, 1], [], []>} : vector<256x256xf32>, vector<256x128xf32>, vector<256x128xf32> -> vector<256x128xf32>
    %21 = vector.extract_strided_slice %20 {offsets = [0, 0], sizes = [200, 128], strides = [1, 1]} : vector<256x128xf32> to vector<200x128xf32>
    %c0_16 = arith.constant 0 : index
    %c0_17 = arith.constant 0 : index
    %22 = vector.load %arg6[%c0_16, %c0_17] : memref<256x1xf32, #tpu.memory_space<vmem>>, vector<200x1xf32>
    %23 = vector.broadcast %22 : vector<200x1xf32> to vector<200x128xf32>
    %24 = arith.addf %21, %23 : vector<200x128xf32>
    %25 = math.tanh %24 : vector<200x128xf32>
    %c0_18 = arith.constant 0 : index
    %c0_19 = arith.constant 0 : index
    %26 = vector.load %arg7[%c0_18, %c0_19] : memref<256x1xf32, #tpu.memory_space<vmem>>, vector<200x1xf32>
    %27 = vector.broadcast %26 : vector<200x1xf32> to vector<200x128xf32>
    %28 = arith.mulf %27, %25 : vector<200x128xf32>
    %cst_20 = arith.constant dense<0.000000e+00> : vector<128xf32>
    %29 = vector.multi_reduction <add>, %28, %cst_20 [0] : vector<200x128xf32> to vector<128xf32>
    %30 = vector.shape_cast %29 : vector<128xf32> to vector<1x128xf32>
    %c0_21 = arith.constant 0 : index
    %c0_22 = arith.constant 0 : index
    %31 = vector.load %arg8[%c0_21, %c0_22] : memref<1x128xf32, #tpu.memory_space<vmem>>, vector<1x128xf32>
    tpu.vector_store %arg8[%c0_21, %c0_22], %30 {strides = array<i32>} : memref<1x128xf32, #tpu.memory_space<vmem>>, vector<1x128xf32>,
    return
  }
  func.func @transform_0(%arg0: i32) -> (i32, i32) {
    %c0_i32 = arith.constant 0 : i32
    %c0_i32_0 = arith.constant 0 : i32
    return %c0_i32, %arg0 : i32, i32
  }
  func.func @transform_1(%arg0: i32) -> (i32, i32) {
    %c0_i32 = arith.constant 0 : i32
    %c0_i32_0 = arith.constant 0 : i32
    %c0_i32_1 = arith.constant 0 : i32
    return %c0_i32, %c0_i32_0 : i32, i32
  }
  func.func @transform_2(%arg0: i32) -> (i32, i32) {
    %c0_i32 = arith.constant 0 : i32
    %c0_i32_0 = arith.constant 0 : i32
    %c0_i32_1 = arith.constant 0 : i32
    return %c0_i32, %c0_i32_0 : i32, i32
  }
  func.func @transform_3(%arg0: i32) -> (i32, i32) {
    %c0_i32 = arith.constant 0 : i32
    %c0_i32_0 = arith.constant 0 : i32
    %c0_i32_1 = arith.constant 0 : i32
    return %c0_i32, %c0_i32_0 : i32, i32
  }
  func.func @transform_4(%arg0: i32) -> (i32, i32) {
    %c0_i32 = arith.constant 0 : i32
    %c0_i32_0 = arith.constant 0 : i32
    %c0_i32_1 = arith.constant 0 : i32
    return %c0_i32, %c0_i32_0 : i32, i32
  }
  func.func @transform_5(%arg0: i32) -> (i32, i32) {
    %c0_i32 = arith.constant 0 : i32
    %c0_i32_0 = arith.constant 0 : i32
    %c0_i32_1 = arith.constant 0 : i32
    return %c0_i32, %c0_i32_0 : i32, i32
  }
  func.func @transform_6(%arg0: i32) -> (i32, i32) {
    %c0_i32 = arith.constant 0 : i32
    %c0_i32_0 = arith.constant 0 : i32
    %c0_i32_1 = arith.constant 0 : i32
    return %c0_i32, %c0_i32_0 : i32, i32
  }
  func.func @transform_7(%arg0: i32) -> (i32, i32) {
    %c0_i32 = arith.constant 0 : i32
    %c0_i32_0 = arith.constant 0 : i32
    return %c0_i32, %arg0 : i32, i32
  }
}

</mosaic_0001>

<bundles_post_ra>
// kernel: tpu_custom_call.1
= control target key start
LH: loop header
LB: loop body
LE: loop exit
PB: predicated region body
PF: predicated region fallthrough
CT: control target
= control target key end

     0   :  { %v1572_v2 = vmov 0   ;;  %s2417_s0 = inlined_call_operand.vmem [shape: f32[2,128], index: 0, kind: input, shape index: {}]   ;;  %s2418_s1 = inlined_call_operand.vmem [shape: f32[256,1], index: 1, kind: input, shape index: {}]   ;;  %s2419_s2 = inlined_call_operand.vmem [shape: f32[256,1], index: 2, kind: input, shape index: {}]   ;;  %s2420_s3 = inlined_call_operand.vmem [shape: f32[256,1], index: 3, kind: input, shape index: {}]   ;;  %s2421_s4 = inlined_call_operand.vmem [shape: f32[256,256], index: 4, kind: input, shape index: {}]   ;;  %s2422_s5 = inlined_call_operand.vmem [shape: f32[256,1], index: 5, kind: input, shape index: {}]   ;;  %s2423_s6 = inlined_call_operand.vmem [shape: f32[256,1], index: 6, kind: input, shape index: {}]   ;;  %s2424_s7 = inlined_call_operand.hbm [shape: f32[1,128], index: 7, kind: output, shape index: {}]  }
   0x1   :  { %v31_v0 = vld [vmem:[%s2418_s1 + $0x10] sm:$0xff]  ;;  %v29_v1 = vld [vmem:[%s2418_s1] sm:$0xff]  ;;  %1447 = vset.pattern.permute.xlu1 %v1572_v2  ;;  %1446 = vset.pattern.permute.xlu0 %v1572_v2  ;;  %v32_v3 = vld [vmem:[%s2418_s1 + $0x18] sm:$0xff] }
   0x2   :  { %66 = vperm.xlu1 %1447, %v31_v0   ;;  %56 = vperm.xlu0 %1446, %v29_v1   ;;  %v30_v4 = vld [vmem:[%s2418_s1 + $0x8] sm:$0xff]  ;;  %v33_v6 = vld [vmem:[%s2418_s1 + $0x20] sm:$0xff]  ;;  %v36_v7 = vld [vmem:[%s2418_s1 + $0x38] sm:$0xff] }
   0x3   :  { %v34_v5 = vld [vmem:[%s2418_s1 + $0x28] sm:$0xff]  ;;  %v35_v8 = vld [vmem:[%s2418_s1 + $0x30] sm:$0xff]  ;;  %v37_v10 = vld [vmem:[%s2418_s1 + $0x40] sm:$0xff] }
   0x4   :  { %v38_v9 = vld [vmem:[%s2418_s1 + $0x48] sm:$0xff]  ;;  %v40_v11 = vld [vmem:[%s2418_s1 + $0x58] sm:$0xff]  ;;  %v39_v12 = vld [vmem:[%s2418_s1 + $0x50] sm:$0xff] }
   0x5   :  { %v209_v13 = vld [vmem:[%s2419_s2 + $0x8] sm:$0xff]  ;;  %v208_v14 = vld [vmem:[%s2419_s2] sm:$0xff] }
   0x6   :  { %71 = vperm.xlu1 %1447, %v32_v3   ;;  %61 = vperm.xlu0 %1446, %v30_v4  }
   0xa   :  { %81 = vperm.xlu1 %1447, %v34_v5   ;;  %76 = vperm.xlu0 %1446, %v33_v6  }
   0xe   :  { %91 = vperm.xlu1 %1447, %v36_v7   ;;  %86 = vperm.xlu0 %1446, %v35_v8  }
  0x12   :  { %101 = vperm.xlu1 %1447, %v38_v9   ;;  %96 = vperm.xlu0 %1446, %v37_v10  }
  0x16   :  { %111 = vperm.xlu1 %1447, %v40_v11   ;;  %106 = vperm.xlu0 %1446, %v39_v12  }
  0x1a   :  { %240 = vperm.xlu1 %1447, %v209_v13   ;;  %235 = vperm.xlu0 %1446, %v208_v14  }
  0x1b   :  { %12 = vsyncpa [#allocation4], 0  ;;  %v211_v15 = vld [vmem:[%s2419_s2 + $0x18] sm:$0xff]  ;;  %v210_v16 = vld [vmem:[%s2419_s2 + $0x10] sm:$0xff]  ;;  %v1573_v27 = vmov 0.0|0.0  }
  0x1c   :  { %v413_v17 = vld [vmem:[%s2420_s3 + $0x8] sm:$0xff]  ;;  %v412_v18 = vld [vmem:[%s2420_s3] sm:$0xff]  ;;  %v415_v21 = vld [vmem:[%s2420_s3 + $0x18] sm:$0xff]  ;;  %1380 = vmatprep.subr.bf16.mxu0 %v1573_v27  ;;  %1416 = vmatprep.subr.bf16.mxu1 %v1573_v27 }
  0x1d   :  { %v213_v19 = vld [vmem:[%s2419_s2 + $0x28] sm:$0xff]  ;;  %v212_v20 = vld [vmem:[%s2419_s2 + $0x20] sm:$0xff]  ;;  %v414_v22 = vld [vmem:[%s2420_s3 + $0x10] sm:$0xff] }
  0x1e   :  { %250 = vperm.xlu1 %1447, %v211_v15   ;;  %245 = vperm.xlu0 %1446, %v210_v16   ;;  %v215_v23 = vld [vmem:[%s2419_s2 + $0x38] sm:$0xff]  ;;  %v214_v24 = vld [vmem:[%s2419_s2 + $0x30] sm:$0xff]  ;;  %v417_v25 = vld [vmem:[%s2420_s3 + $0x28] sm:$0xff] }
  0x1f   :  { %v416_v26 = vld [vmem:[%s2420_s3 + $0x20] sm:$0xff]  ;;  %v217_v28 = vld [vmem:[%s2419_s2 + $0x48] sm:$0xff]  ;;  %v419_v30 = vld [vmem:[%s2420_s3 + $0x38] sm:$0xff] }
  0x20   :  { %v216_v29 = vld [vmem:[%s2419_s2 + $0x40] sm:$0xff]  ;;  %v418_v31 = vld [vmem:[%s2420_s3 + $0x30] sm:$0xff]  ;;  %v219_v32 = vld [vmem:[%s2419_s2 + $0x58] sm:$0xff] }
  0x21   :  { %v218_v33 = vld [vmem:[%s2419_s2 + $0x50] sm:$0xff]  ;;  %v421_v34 = vld [vmem:[%s2420_s3 + $0x48] sm:$0xff]  ;;  %v420_v35 = vld [vmem:[%s2420_s3 + $0x40] sm:$0xff] }
  0x22   :  { %444 = vperm.xlu1 %1447, %v413_v17   ;;  %439 = vperm.xlu0 %1446, %v412_v18   ;;  %v42_v36 = vld [vmem:[%s2418_s1 + $0x68] sm:$0xff]  ;;  %v41_v37 = vld [vmem:[%s2418_s1 + $0x60] sm:$0xff]  ;;  %v423_v40 = vld [vmem:[%s2420_s3 + $0x58] sm:$0xff] }
  0x23   :  { %v221_v38 = vld [vmem:[%s2419_s2 + $0x68] sm:$0xff]  ;;  %v220_v39 = vld [vmem:[%s2419_s2 + $0x60] sm:$0xff]  ;;  %v422_v41 = vld [vmem:[%s2420_s3 + $0x50] sm:$0xff] }
  0x24   :  { %v44_v42 = vld [vmem:[%s2418_s1 + $0x78] sm:$0xff]  ;;  %v43_v43 = vld [vmem:[%s2418_s1 + $0x70] sm:$0xff]  ;;  %v425_v46 = vld [vmem:[%s2420_s3 + $0x68] sm:$0xff] }
  0x25   :  { %v223_v44 = vld [vmem:[%s2419_s2 + $0x78] sm:$0xff]  ;;  %v222_v45 = vld [vmem:[%s2419_s2 + $0x70] sm:$0xff]  ;;  %v424_v47 = vld [vmem:[%s2420_s3 + $0x60] sm:$0xff] }
  0x26   :  { %260 = vperm.xlu1 %1447, %v213_v19   ;;  %255 = vperm.xlu0 %1446, %v212_v20   ;;  %v46_v48 = vld [vmem:[%s2418_s1 + $0x88] sm:$0xff]  ;;  %v45_v49 = vld [vmem:[%s2418_s1 + $0x80] sm:$0xff]  ;;  %v427_v52 = vld [vmem:[%s2420_s3 + $0x78] sm:$0xff] }
  0x27   :  { %v225_v50 = vld [vmem:[%s2419_s2 + $0x88] sm:$0xff]  ;;  %v224_v51 = vld [vmem:[%s2419_s2 + $0x80] sm:$0xff]  ;;  %v426_v53 = vld [vmem:[%s2420_s3 + $0x70] sm:$0xff] }
  0x28   :  { %v48_v54 = vld [vmem:[%s2418_s1 + $0x98] sm:$0xff]  ;;  %v47_v55 = vld [vmem:[%s2418_s1 + $0x90] sm:$0xff]  ;;  %v429_v58 = vld [vmem:[%s2420_s3 + $0x88] sm:$0xff] }
  0x29   :  { %v227_v56 = vld [vmem:[%s2419_s2 + $0x98] sm:$0xff]  ;;  %v226_v57 = vld [vmem:[%s2419_s2 + $0x90] sm:$0xff]  ;;  %v428_v59 = vld [vmem:[%s2420_s3 + $0x80] sm:$0xff] }
  0x2a   :  { %454 = vperm.xlu1 %1447, %v415_v21   ;;  %449 = vperm.xlu0 %1446, %v414_v22   ;;  %v50_v60 = vld [vmem:[%s2418_s1 + $0xa8] sm:$0xff]  ;;  %v49_v61 = vld [vmem:[%s2418_s1 + $0xa0] sm:$0xff]  ;;  %v431_v0 = vld [vmem:[%s2420_s3 + $0x98] sm:$0xff] }
  0x2b   :  { %v229_v62 = vld [vmem:[%s2419_s2 + $0xa8] sm:$0xff]  ;;  %v228_v63 = vld [vmem:[%s2419_s2 + $0xa0] sm:$0xff]  ;;  %v430_v1 = vld [vmem:[%s2420_s3 + $0x90] sm:$0xff] }
  0x2c   :  { %v52_v2 = vld [vmem:[%s2418_s1 + $0xb8] sm:$0xff]  ;;  %v51_v3 = vld [vmem:[%s2418_s1 + $0xb0] sm:$0xff]  ;;  %v433_v10 = vld [vmem:[%s2420_s3 + $0xa8] sm:$0xff] }
  0x2d   :  { %v231_v6 = vld [vmem:[%s2419_s2 + $0xb8] sm:$0xff]  ;;  %v230_v7 = vld [vmem:[%s2419_s2 + $0xb0] sm:$0xff]  ;;  %v432_v11 = vld [vmem:[%s2420_s3 + $0xa0] sm:$0xff] }
  0x2e   :  { %270 = vperm.xlu1 %1447, %v215_v23   ;;  %265 = vperm.xlu0 %1446, %v214_v24   ;;  %v435_v14 = vld [vmem:[%s2420_s3 + $0xb8] sm:$0xff]  ;;  %v434_v15 = vld [vmem:[%s2420_s3 + $0xb0] sm:$0xff]  ;;  %v232_v18 = vld [vmem:[%s2419_s2 + $0xc0] sm:$0xff] }
  0x2f   :  { %v53_v19 = vld [vmem:[%s2418_s1 + $0xc0] sm:$0xff] }
  0x30   :  { %v958_v22 = vld [vmem:[%s2422_s5] sm:$0xff] }
  0x31   :  { %v436_v23 = vld [vmem:[%s2420_s3 + $0xc0] sm:$0xff] }
  0x32   :  { %464 = vperm.xlu1 %1447, %v417_v25   ;;  %459 = vperm.xlu0 %1446, %v416_v26   ;;  %v960_v26 = vld [vmem:[%s2422_s5 + $0x10] sm:$0xff] }
  0x36   :  { %280 = vperm.xlu1 %1447, %v217_v28   ;;  %275 = vperm.xlu0 %1446, %v216_v29   ;;  %v959_v28 = vld [vmem:[%s2422_s5 + $0x8] sm:$0xff] }
  0x3a   :  { %474 = vperm.xlu1 %1447, %v419_v30   ;;  %469 = vperm.xlu0 %1446, %v418_v31   ;;  %v1875_v30 = vld [vmem:[%s2417_s0 + $0x1] ss:$0 sm:$0xff] }
  0x3e   :  { %290 = vperm.xlu1 %1447, %v219_v32   ;;  %285 = vperm.xlu0 %1446, %v218_v33   ;;  %v1880_v32 = vld [vmem:[%s2417_s0] ss:$0 sm:$0xff] }
  0x3f   :  { %v962_v33 = vld [vmem:[%s2422_s5 + $0x20] sm:$0xff] }
  0x42   :  { %484 = vperm.xlu1 %1447, %v421_v34   ;;  %479 = vperm.xlu0 %1446, %v420_v35   ;;  %v961_v34 = vld [vmem:[%s2422_s5 + $0x18] sm:$0xff] }
  0x46   :  { %121 = vperm.xlu1 %1447, %v42_v36   ;;  %116 = vperm.xlu0 %1446, %v41_v37  }
  0x4a   :  { %300 = vperm.xlu1 %1447, %v221_v38   ;;  %295 = vperm.xlu0 %1446, %v220_v39  }
  0x4e   :  { %494 = vperm.xlu1 %1447, %v423_v40   ;;  %489 = vperm.xlu0 %1446, %v422_v41   ;;  %v964_v41 = vld [vmem:[%s2422_s5 + $0x30] sm:$0xff] }
  0x52   :  { %131 = vperm.xlu1 %1447, %v44_v42   ;;  %126 = vperm.xlu0 %1446, %v43_v43   ;;  %v963_v42 = vld [vmem:[%s2422_s5 + $0x28] sm:$0xff] }
  0x56   :  { %310 = vperm.xlu1 %1447, %v223_v44   ;;  %305 = vperm.xlu0 %1446, %v222_v45  }
  0x5a   :  { %504 = vperm.xlu1 %1447, %v425_v46   ;;  %499 = vperm.xlu0 %1446, %v424_v47  }
  0x5e   :  { %141 = vperm.xlu1 %1447, %v46_v48   ;;  %136 = vperm.xlu0 %1446, %v45_v49   ;;  %v966_v49 = vld [vmem:[%s2422_s5 + $0x40] sm:$0xff] }
  0x62   :  { %320 = vperm.xlu1 %1447, %v225_v50   ;;  %315 = vperm.xlu0 %1446, %v224_v51   ;;  %v965_v50 = vld [vmem:[%s2422_s5 + $0x38] sm:$0xff]  ;;  %v645_v51 = vld [vmem:[%s2421_s4 + $0x8] sm:$0xff] }
  0x63   :  { %804 = vmatprep.mubr.f32.mxu0 %v645_v51  ;;  %v1159_v51 = vld [vmem:[%s2423_s6 + $0x8] sm:$0xff] }
  0x66   :  { %514 = vperm.xlu1 %1447, %v427_v52   ;;  %509 = vperm.xlu0 %1446, %v426_v53   ;;  %v677_v52 = vld [vmem:[%s2421_s4 + $0x108] sm:$0xff] }
  0x67   :  { %884 = vmatprep.mubr.f32.mxu1 %v677_v52 }
  0x6a   :  { %151 = vperm.xlu1 %1447, %v48_v54   ;;  %146 = vperm.xlu0 %1446, %v47_v55  }
  0x6e   :  { %330 = vperm.xlu1 %1447, %v227_v56   ;;  %325 = vperm.xlu0 %1446, %v226_v57  }
  0x72   :  { %524 = vperm.xlu1 %1447, %v429_v58   ;;  %519 = vperm.xlu0 %1446, %v428_v59   ;;  %v968_v59 = vld [vmem:[%s2422_s5 + $0x50] sm:$0xff] }
  0x76   :  { %161 = vperm.xlu1 %1447, %v50_v60   ;;  %156 = vperm.xlu0 %1446, %v49_v61   ;;  %v967_v60 = vld [vmem:[%s2422_s5 + $0x48] sm:$0xff] }
  0x7a   :  { %340 = vperm.xlu1 %1447, %v229_v62   ;;  %335 = vperm.xlu0 %1446, %v228_v63  }
  0x7e   :  { %534 = vperm.xlu1 %1447, %v431_v0   ;;  %529 = vperm.xlu0 %1446, %v430_v1  }
  0x81   :  { %v1816_v4 = vpop.permute.xlu1 %66  ;;  %v57_v5 = vpop.permute.xlu0 %56 }
  0x82   :  { %171 = vperm.xlu1 %1447, %v52_v2   ;;  %166 = vperm.xlu0 %1446, %v51_v3   ;;  %v183_v39 = vmul.f32 %v1880_v32, %v57_v5  ;;  %v185_v57 = vmul.f32 %v1880_v32, %v1816_v4  ;;  %v970_v3 = vld [vmem:[%s2422_s5 + $0x60] sm:$0xff]  ;;  %v969_v4 = vld [vmem:[%s2422_s5 + $0x58] sm:$0xff] }
  0x85   :  { %v1824_v8 = vpop.permute.xlu1 %71  ;;  %v62_v9 = vpop.permute.xlu0 %61 }
  0x86   :  { %350 = vperm.xlu1 %1447, %v231_v6   ;;  %345 = vperm.xlu0 %1446, %v230_v7   ;;  %v184_v40 = vmul.f32 %v1880_v32, %v62_v9  ;;  %v186_v58 = vmul.f32 %v1880_v32, %v1824_v8 }
  0x89   :  { %v1832_v12 = vpop.permute.xlu1 %81  ;;  %v1834_v13 = vpop.permute.xlu0 %76 }
  0x8a   :  { %544 = vperm.xlu1 %1447, %v433_v10   ;;  %539 = vperm.xlu0 %1446, %v432_v11   ;;  %v188_v10 = vmul.f32 %v1880_v32, %v1832_v12  ;;  %v187_v11 = vmul.f32 %v1880_v32, %v1834_v13 }
  0x8d   :  { %v1842_v16 = vpop.permute.xlu1 %91  ;;  %v1844_v17 = vpop.permute.xlu0 %86 }
  0x8e   :  { %554 = vperm.xlu1 %1447, %v435_v14   ;;  %549 = vperm.xlu0 %1446, %v434_v15  }
  0x91   :  { %v1852_v20 = vpop.permute.xlu1 %101  ;;  %v1854_v21 = vpop.permute.xlu0 %96 }
  0x92   :  { %355 = vperm.xlu1 %1447, %v232_v18   ;;  %176 = vperm.xlu0 %1446, %v53_v19  }
  0x95   :  { %v1862_v24 = vpop.permute.xlu1 %111  ;;  %v1864_v25 = vpop.permute.xlu0 %106 }
  0x96   :  { %985 = vperm.xlu1 %1447, %v958_v22   ;;  %559 = vperm.xlu0 %1446, %v436_v23   ;;  %v972_v22 = vld [vmem:[%s2422_s5 + $0x70] sm:$0xff]  ;;  %v971_v23 = vld [vmem:[%s2422_s5 + $0x68] sm:$0xff] }
  0x99   :  { %v241_v29 = vpop.permute.xlu1 %240  ;;  %v236_v31 = vpop.permute.xlu0 %235 }
  0x9a   :  { %995 = vperm.xlu1 %1447, %v960_v26   ;;  %990 = vperm.xlu0 %1446, %v959_v28   ;;  %v363_v35 = vmul.f32 %v1875_v30, %v241_v29  ;;  %v362_v36 = vmul.f32 %v1875_v30, %v236_v31 }
  0x9c   :  { %v388_v43 = vadd.f32 %v363_v35, %v184_v40  ;;  %v387_v44 = vadd.f32 %v362_v36, %v183_v39  ;;  %v189_v39 = vmul.f32 %v1880_v32, %v1844_v17 }
  0x9d   :  { %v251_v37 = vpop.permute.xlu1 %250  ;;  %v246_v38 = vpop.permute.xlu0 %245 }
  0x9e   :  { %1005 = vperm.xlu1 %1447, %v962_v33   ;;  %1000 = vperm.xlu0 %1446, %v961_v34   ;;  %v365_v53 = vmul.f32 %v1875_v30, %v251_v37  ;;  %v364_v54 = vmul.f32 %v1875_v30, %v246_v38  ;;  %v974_v33 = vld [vmem:[%s2422_s5 + $0x80] sm:$0xff]  ;;  %v973_v34 = vld [vmem:[%s2422_s5 + $0x78] sm:$0xff]  ;;  %v190_v38 = vmul.f32 %v1880_v32, %v1842_v16 }
  0xa0   :  { %v390_v61 = vadd.f32 %v365_v53, %v186_v58  ;;  %v389_v62 = vadd.f32 %v364_v54, %v185_v57 }
  0xa1   :  { %v445_v45 = vpop.permute.xlu1 %444  ;;  %v440_v46 = vpop.permute.xlu0 %439 }
  0xa2   :  { %v563_v47 = vadd.f32 %v445_v45, %v388_v43  ;;  %v562_v48 = vadd.f32 %v440_v46, %v387_v44  ;;  %1015 = vperm.xlu1 %1447, %v964_v41   ;;  %1010 = vperm.xlu0 %1446, %v963_v42   ;;  %v1158_v44 = vld [vmem:[%s2423_s6] sm:$0xff]  ;;  %v975_v45 = vld [vmem:[%s2422_s5 + $0x88] sm:$0xff] }
  0xa4   :  { %1448 = vtanh.f32 %v563_v47 }
  0xa5   :  { %1450 = vtanh.f32 %v562_v48  ;;  %v261_v55 = vpop.permute.xlu1 %260  ;;  %v256_v56 = vpop.permute.xlu0 %255 }
  0xa6   :  { %1025 = vperm.xlu1 %1447, %v966_v49   ;;  %1020 = vperm.xlu0 %1446, %v965_v50   ;;  %v367_v5 = vmul.f32 %v1875_v30, %v261_v55  ;;  %v366_v6 = vmul.f32 %v1875_v30, %v256_v56  ;;  %v1160_v50 = vld [vmem:[%s2423_s6 + $0x10] sm:$0xff]  ;;  %v192_v55 = vmul.f32 %v1880_v32, %v1852_v20 }
  0xa7   :  { %v191_v56 = vmul.f32 %v1880_v32, %v1854_v21  ;;  %v1164_v21 = vld [vmem:[%s2423_s6 + $0x30] sm:$0xff] }
  0xa8   :  { %v392_v15 = vadd.f32 %v367_v5, %v188_v10  ;;  %v391_v18 = vadd.f32 %v366_v6, %v187_v11  ;;  %v1166_v10 = vld [vmem:[%s2423_s6 + $0x40] sm:$0xff]  ;;  %v1165_v11 = vld [vmem:[%s2423_s6 + $0x38] sm:$0xff] }
  0xa9   :  { %v455_v63 = vpop.permute.xlu1 %454  ;;  %v450_v0 = vpop.permute.xlu0 %449 }
  0xaa   :  { %v565_v1 = vadd.f32 %v455_v63, %v390_v61  ;;  %v564_v2 = vadd.f32 %v450_v0, %v389_v62  ;;  %1035 = vperm.xlu1 %1447, %v968_v59   ;;  %1030 = vperm.xlu0 %1446, %v967_v60   ;;  %v1162_v61 = vld [vmem:[%s2423_s6 + $0x20] sm:$0xff]  ;;  %v1161_v62 = vld [vmem:[%s2423_s6 + $0x18] sm:$0xff] }
  0xac   :  { %1452 = vtanh.f32 %v565_v1 }
  0xad   :  { %1454 = vtanh.f32 %v564_v2  ;;  %v271_v7 = vpop.permute.xlu1 %270  ;;  %v266_v8 = vpop.permute.xlu0 %265  ;;  %v1163_v2 = vld [vmem:[%s2423_s6 + $0x28] sm:$0xff] }
  0xae   :  { %v1449_v9 = vpop.eup %1448  ;;  %1045 = vperm.xlu1 %1447, %v970_v3   ;;  %1040 = vperm.xlu0 %1446, %v969_v4   ;;  %v369_v13 = vmul.f32 %v1875_v30, %v271_v7  ;;  %v368_v31 = vmul.f32 %v1875_v30, %v266_v8 }
  0xaf   :  { %v1451_v14 = vpop.eup %1450 }
  0xb0   :  { %v1381_v19 = vpack.c.bf16 %v1449_v9, %v1451_v14  ;;  %v394_v41 = vadd.f32 %v369_v13, %v190_v38  ;;  %v393_v42 = vadd.f32 %v368_v31, %v189_v39 }
  0xb1   :  { %v465_v26 = vpop.permute.xlu1 %464  ;;  %v460_v28 = vpop.permute.xlu0 %459 }
  0xb2   :  { %v567_v12 = vadd.f32 %v465_v26, %v392_v15  ;;  %v566_v29 = vadd.f32 %v460_v28, %v391_v18  ;;  %1382 = vmatpush1.bf16.msra.mxu0 %v1381_v19  ;;  %1429 = vmatpush1.bf16.msra.mxu1 %v1381_v19  ;;  %v194_v18 = vmul.f32 %v1880_v32, %v1862_v24  ;;  %v1168_v26 = vld [vmem:[%s2423_s6 + $0x50] sm:$0xff]  ;;  %v1167_v28 = vld [vmem:[%s2423_s6 + $0x48] sm:$0xff] }
  0xb3   :  { %1055 = vperm.xlu1 %1447, %v972_v22   ;;  %1050 = vperm.xlu0 %1446, %v971_v23   ;;  %v193_v19 = vmul.f32 %v1880_v32, %v1864_v25 }
  0xb4   :  { %1456 = vtanh.f32 %v567_v12  ;;  %1383 = vmatprep.subr.bf16.mxu0 %v1573_v27  ;;  %1417 = vmatprep.subr.bf16.mxu1 %v1573_v27 }
  0xb5   :  { %1458 = vtanh.f32 %v566_v29  ;;  %v281_v35 = vpop.permute.xlu1 %280  ;;  %v276_v36 = vpop.permute.xlu0 %275 }
  0xb6   :  { %v1453_v37 = vpop.eup %1452  ;;  %v371_v17 = vmul.f32 %v1875_v30, %v281_v35  ;;  %v370_v49 = vmul.f32 %v1875_v30, %v276_v36  ;;  %v1169_v35 = vld [vmem:[%s2423_s6 + $0x58] sm:$0xff] }
  0xb7   :  { %v1455_v40 = vpop.eup %1454  ;;  %1065 = vperm.xlu1 %1447, %v974_v33   ;;  %1060 = vperm.xlu0 %1446, %v973_v34   ;;  %v976_v34 = vld [vmem:[%s2422_s5 + $0x90] sm:$0xff] }
  0xb8   :  { %v1384_v43 = vpack.c.bf16 %v1453_v37, %v1455_v40  ;;  %v396_v58 = vadd.f32 %v371_v17, %v192_v55  ;;  %v395_v59 = vadd.f32 %v370_v49, %v191_v56  ;;  %v977_v40 = vld [vmem:[%s2422_s5 + $0x98] sm:$0xff]  ;;  %v979_v55 = vld [vmem:[%s2422_s5 + $0xa8] sm:$0xff]  ;;  %v1172_v56 = vld [vmem:[%s2423_s6 + $0x70] sm:$0xff] }
  0xb9   :  { %v475_v46 = vpop.permute.xlu1 %474  ;;  %v470_v47 = vpop.permute.xlu0 %469 }
  0xba   :  { %v569_v16 = vadd.f32 %v475_v46, %v394_v41  ;;  %v568_v48 = vadd.f32 %v470_v47, %v393_v42  ;;  %1385 = vmatpush1.bf16.msra.mxu0 %v1384_v43  ;;  %1430 = vmatpush1.bf16.msra.mxu1 %v1384_v43  ;;  %v1170_v41 = vld [vmem:[%s2423_s6 + $0x60] sm:$0xff] }
  0xbb   :  { %1185 = vperm.xlu1 %1447, %v1158_v44   ;;  %1070 = vperm.xlu0 %1446, %v975_v45  }
  0xbc   :  { %1460 = vtanh.f32 %v569_v16  ;;  %1386 = vmatprep.subr.bf16.mxu0 %v1573_v27  ;;  %1418 = vmatprep.subr.bf16.mxu1 %v1573_v27  ;;  %v978_v16 = vld [vmem:[%s2422_s5 + $0xa0] sm:$0xff] }
  0xbd   :  { %1462 = vtanh.f32 %v568_v48  ;;  %v291_v52 = vpop.permute.xlu1 %290  ;;  %v286_v53 = vpop.permute.xlu0 %285  ;;  %v1171_v48 = vld [vmem:[%s2423_s6 + $0x68] sm:$0xff] }
  0xbe   :  { %v1457_v54 = vpop.eup %1456  ;;  %v373_v7 = vmul.f32 %v1875_v30, %v291_v52  ;;  %v372_v8 = vmul.f32 %v1875_v30, %v286_v53 }
  0xbf   :  { %v1459_v57 = vpop.eup %1458  ;;  %1195 = vperm.xlu1 %1447, %v1160_v50   ;;  %1190 = vperm.xlu0 %1446, %v1159_v51  }
  0xc0   :  { %v1387_v60 = vpack.c.bf16 %v1457_v54, %v1459_v57  ;;  %v398_v22 = vadd.f32 %v373_v7, %v194_v18  ;;  %v397_v23 = vadd.f32 %v372_v8, %v193_v19 }
  0xc1   :  { %v485_v63 = vpop.permute.xlu1 %484  ;;  %v480_v0 = vpop.permute.xlu0 %479 }
  0xc2   :  { %v571_v20 = vadd.f32 %v485_v63, %v396_v58  ;;  %v570_v1 = vadd.f32 %v480_v0, %v395_v59  ;;  %1388 = vmatpush1.bf16.msra.mxu0 %v1387_v60  ;;  %1431 = vmatpush1.bf16.msra.mxu1 %v1387_v60 }
  0xc3   :  { %1205 = vperm.xlu1 %1447, %v1162_v61   ;;  %1200 = vperm.xlu0 %1446, %v1161_v62   ;;  %v980_v61 = vld [vmem:[%s2422_s5 + $0xb0] sm:$0xff]  ;;  %v1173_v62 = vld [vmem:[%s2423_s6 + $0x78] sm:$0xff] }
  0xc4   :  { %1464 = vtanh.f32 %v571_v20  ;;  %1389 = vmatprep.subr.bf16.mxu0 %v1573_v27  ;;  %1419 = vmatprep.subr.bf16.mxu1 %v1573_v27 }
  0xc5   :  { %1466 = vtanh.f32 %v570_v1  ;;  %v122_v3 = vpop.permute.xlu1 %121  ;;  %v117_v4 = vpop.permute.xlu0 %116 }
  0xc6   :  { %v1461_v5 = vpop.eup %1460  ;;  %v196_v44 = vmul.f32 %v1880_v32, %v122_v3  ;;  %v195_v45 = vmul.f32 %v1880_v32, %v117_v4  ;;  %v981_v3 = vld [vmem:[%s2422_s5 + $0xb8] sm:$0xff]  ;;  %v1174_v4 = vld [vmem:[%s2423_s6 + $0x80] sm:$0xff] }
  0xc7   :  { %v1463_v6 = vpop.eup %1462  ;;  %1215 = vperm.xlu1 %1447, %v1164_v21   ;;  %1210 = vperm.xlu0 %1446, %v1163_v2  }
  0xc8   :  { %v1390_v9 = vpack.c.bf16 %v1461_v5, %v1463_v6 }
  0xc9   :  { %v301_v14 = vpop.permute.xlu1 %300  ;;  %v296_v15 = vpop.permute.xlu0 %295 }
  0xca   :  { %1391 = vmatpush1.bf16.msra.mxu0 %v1390_v9  ;;  %1432 = vmatpush1.bf16.msra.mxu1 %v1390_v9  ;;  %v375_v38 = vmul.f32 %v1875_v30, %v301_v14  ;;  %v374_v39 = vmul.f32 %v1875_v30, %v296_v15  ;;  %v982_v14 = vld [vmem:[%s2422_s5 + $0xc0] sm:$0xff]  ;;  %v1175_v15 = vld [vmem:[%s2423_s6 + $0x88] sm:$0xff] }
  0xcb   :  { %1225 = vperm.xlu1 %1447, %v1166_v10   ;;  %1220 = vperm.xlu0 %1446, %v1165_v11  }
  0xcc   :  { %1392 = vmatprep.subr.bf16.mxu0 %v1573_v27  ;;  %1420 = vmatprep.subr.bf16.mxu1 %v1573_v27  ;;  %v400_v46 = vadd.f32 %v375_v38, %v196_v44  ;;  %v399_v47 = vadd.f32 %v374_v39, %v195_v45 }
  0xcd   :  { %v495_v24 = vpop.permute.xlu1 %494  ;;  %v490_v25 = vpop.permute.xlu0 %489 }
  0xce   :  { %v1465_v12 = vpop.eup %1464  ;;  %v573_v29 = vadd.f32 %v495_v24, %v398_v22  ;;  %v572_v13 = vadd.f32 %v490_v25, %v397_v23 }
  0xcf   :  { %v1467_v31 = vpop.eup %1466  ;;  %1235 = vperm.xlu1 %1447, %v1168_v26   ;;  %1230 = vperm.xlu0 %1446, %v1167_v28   ;;  %v1177_v26 = vld [vmem:[%s2423_s6 + $0x98] sm:$0xff]  ;;  %v1176_v28 = vld [vmem:[%s2423_s6 + $0x90] sm:$0xff] }
  0xd0   :  { %1468 = vtanh.f32 %v573_v29  ;;  %v1393_v33 = vpack.c.bf16 %v1465_v12, %v1467_v31 }
  0xd1   :  { %1470 = vtanh.f32 %v572_v13  ;;  %v132_v36 = vpop.permute.xlu1 %131  ;;  %v127_v37 = vpop.permute.xlu0 %126 }
  0xd2   :  { %1394 = vmatpush1.bf16.msra.mxu0 %v1393_v33  ;;  %1433 = vmatpush1.bf16.msra.mxu1 %v1393_v33  ;;  %v198_v20 = vmul.f32 %v1880_v32, %v132_v36  ;;  %v197_v1 = vmul.f32 %v1880_v32, %v127_v37  ;;  %v1179_v33 = vld [vmem:[%s2423_s6 + $0xa8] sm:$0xff] }
  0xd3   :  { %1075 = vperm.xlu1 %1447, %v976_v34   ;;  %1240 = vperm.xlu0 %1446, %v1169_v35   ;;  %v1178_v34 = vld [vmem:[%s2423_s6 + $0xa0] sm:$0xff] }
  0xd4   :  { %1395 = vmatprep.subr.bf16.mxu0 %v1573_v27  ;;  %1421 = vmatprep.subr.bf16.mxu1 %v1573_v27 }
  0xd5   :  { %v311_v42 = vpop.permute.xlu1 %310  ;;  %v306_v43 = vpop.permute.xlu0 %305 }
  0xd6   :  { %v377_v59 = vmul.f32 %v1875_v30, %v311_v42  ;;  %v376_v60 = vmul.f32 %v1875_v30, %v306_v43  ;;  %v1181_v42 = vld [vmem:[%s2423_s6 + $0xb8] sm:$0xff]  ;;  %v1180_v43 = vld [vmem:[%s2423_s6 + $0xb0] sm:$0xff] }
  0xd7   :  { %1080 = vperm.xlu1 %1447, %v977_v40   ;;  %1245 = vperm.xlu0 %1446, %v1170_v41  }
  0xd8   :  { %v402_v21 = vadd.f32 %v377_v59, %v198_v20  ;;  %v401_v2 = vadd.f32 %v376_v60, %v197_v1 }
  0xd9   :  { %v505_v17 = vpop.permute.xlu1 %504  ;;  %v500_v49 = vpop.permute.xlu0 %499 }
  0xda   :  { %v1469_v50 = vpop.eup %1468  ;;  %v575_v51 = vadd.f32 %v505_v17, %v400_v46  ;;  %v574_v52 = vadd.f32 %v500_v49, %v399_v47 }
  0xdb   :  { %v1471_v53 = vpop.eup %1470  ;;  %1085 = vperm.xlu1 %1447, %v978_v16   ;;  %1250 = vperm.xlu0 %1446, %v1171_v48   ;;  %v1182_v16 = vld [vmem:[%s2423_s6 + $0xc0] sm:$0xff] }
  0xdc   :  { %1472 = vtanh.f32 %v575_v51  ;;  %v1396_v54 = vpack.c.bf16 %v1469_v50, %v1471_v53 }
  0xdd   :  { %1474 = vtanh.f32 %v574_v52  ;;  %v142_v57 = vpop.permute.xlu1 %141  ;;  %v137_v58 = vpop.permute.xlu0 %136 }
  0xde   :  { %1397 = vmatpush1.bf16.msra.mxu0 %v1396_v54  ;;  %1434 = vmatpush1.bf16.msra.mxu1 %v1396_v54  ;;  %v200_v12 = vmul.f32 %v1880_v32, %v142_v57  ;;  %v199_v29 = vmul.f32 %v1880_v32, %v137_v58 }
  0xdf   :  { %1090 = vperm.xlu1 %1447, %v979_v55   ;;  %1255 = vperm.xlu0 %1446, %v1172_v56  }
  0xe0   :  { %1398 = vmatprep.subr.bf16.mxu0 %v1573_v27  ;;  %1422 = vmatprep.subr.bf16.mxu1 %v1573_v27 }
  0xe1   :  { %v321_v63 = vpop.permute.xlu1 %320  ;;  %v316_v0 = vpop.permute.xlu0 %315 }
  0xe2   :  { %v379_v22 = vmul.f32 %v1875_v30, %v321_v63  ;;  %v378_v23 = vmul.f32 %v1875_v30, %v316_v0 }
  0xe3   :  { %1095 = vperm.xlu1 %1447, %v980_v61   ;;  %1260 = vperm.xlu0 %1446, %v1173_v62  }
  0xe4   :  { %v404_v13 = vadd.f32 %v379_v22, %v200_v12  ;;  %v403_v31 = vadd.f32 %v378_v23, %v199_v29 }
  0xe5   :  { %v515_v5 = vpop.permute.xlu1 %514  ;;  %v510_v6 = vpop.permute.xlu0 %509 }
  0xe6   :  { %v1473_v7 = vpop.eup %1472  ;;  %v577_v8 = vadd.f32 %v515_v5, %v402_v21  ;;  %v576_v9 = vadd.f32 %v510_v6, %v401_v2 }
  0xe7   :  { %v1475_v10 = vpop.eup %1474  ;;  %1100 = vperm.xlu1 %1447, %v981_v3   ;;  %1265 = vperm.xlu0 %1446, %v1174_v4  }
  0xe8   :  { %1476 = vtanh.f32 %v577_v8  ;;  %v1399_v11 = vpack.c.bf16 %v1473_v7, %v1475_v10 }
  0xe9   :  { %1478 = vtanh.f32 %v576_v9  ;;  %v152_v18 = vpop.permute.xlu1 %151  ;;  %v147_v19 = vpop.permute.xlu0 %146 }
  0xea   :  { %1400 = vmatpush1.bf16.msra.mxu0 %v1399_v11  ;;  %1435 = vmatpush1.bf16.msra.mxu1 %v1399_v11  ;;  %v202_v49 = vmul.f32 %v1880_v32, %v152_v18  ;;  %v201_v50 = vmul.f32 %v1880_v32, %v147_v19 }
  0xeb   :  { %1105 = vperm.xlu1 %1447, %v982_v14   ;;  %1270 = vperm.xlu0 %1446, %v1175_v15  }
  0xec   :  { %1401 = vmatprep.subr.bf16.mxu0 %v1573_v27  ;;  %1423 = vmatprep.subr.bf16.mxu1 %v1573_v27 }
  0xed   :  { %v331_v24 = vpop.permute.xlu1 %330  ;;  %v326_v25 = vpop.permute.xlu0 %325 }
  0xee   :  { %v381_v46 = vmul.f32 %v1875_v30, %v331_v24  ;;  %v380_v47 = vmul.f32 %v1875_v30, %v326_v25 }
  0xef   :  { %1280 = vperm.xlu1 %1447, %v1177_v26   ;;  %1275 = vperm.xlu0 %1446, %v1176_v28  }
  0xf0   :  { %v406_v51 = vadd.f32 %v381_v46, %v202_v49  ;;  %v405_v52 = vadd.f32 %v380_v47, %v201_v50  ;;  %v649_v46 = vld [vmem:[%s2421_s4 + $0x28] sm:$0xff]  ;;  %v683_v49 = vld [vmem:[%s2421_s4 + $0x138] sm:$0xff]  ;;  %v650_v50 = vld [vmem:[%s2421_s4 + $0x30] sm:$0xff] }
  0xf1   :  { %v525_v35 = vpop.permute.xlu1 %524  ;;  %v520_v36 = vpop.permute.xlu0 %519  ;;  %v681_v47 = vld [vmem:[%s2421_s4 + $0x128] sm:$0xff] }
  0xf2   :  { %v1477_v37 = vpop.eup %1476  ;;  %v579_v38 = vadd.f32 %v525_v35, %v404_v13  ;;  %v578_v39 = vadd.f32 %v520_v36, %v403_v31 }
  0xf3   :  { %v1479_v40 = vpop.eup %1478  ;;  %1290 = vperm.xlu1 %1447, %v1179_v33   ;;  %1285 = vperm.xlu0 %1446, %v1178_v34  }
  0xf4   :  { %1480 = vtanh.f32 %v579_v38  ;;  %v1402_v41 = vpack.c.bf16 %v1477_v37, %v1479_v40 }
  0xf5   :  { %1482 = vtanh.f32 %v578_v39  ;;  %v162_v44 = vpop.permute.xlu1 %161  ;;  %v157_v45 = vpop.permute.xlu0 %156 }
  0xf6   :  { %1403 = vmatpush1.bf16.msra.mxu0 %v1402_v41  ;;  %1436 = vmatpush1.bf16.msra.mxu1 %v1402_v41  ;;  %v204_v1 = vmul.f32 %v1880_v32, %v162_v44  ;;  %v203_v21 = vmul.f32 %v1880_v32, %v157_v45  ;;  %v676_v41 = vld [vmem:[%s2421_s4 + $0x100] sm:$0xff]  ;;  %v646_v44 = vld [vmem:[%s2421_s4 + $0x10] sm:$0xff] }
  0xf7   :  { %1300 = vperm.xlu1 %1447, %v1181_v42   ;;  %1295 = vperm.xlu0 %1446, %v1180_v43   ;;  %v647_v43 = vld [vmem:[%s2421_s4 + $0x18] sm:$0xff]  ;;  %v678_v45 = vld [vmem:[%s2421_s4 + $0x110] sm:$0xff] }
  0xf8   :  { %1404 = vmatprep.subr.bf16.mxu0 %v1573_v27  ;;  %1424 = vmatprep.subr.bf16.mxu1 %v1573_v27 }
  0xf9   :  { %v341_v48 = vpop.permute.xlu1 %340  ;;  %v336_v17 = vpop.permute.xlu0 %335 }
  0xfa   :  { %v383_v62 = vmul.f32 %v1875_v30, %v341_v48  ;;  %v382_v63 = vmul.f32 %v1875_v30, %v336_v17  ;;  %v680_v48 = vld [vmem:[%s2421_s4 + $0x120] sm:$0xff]  ;;  %v651_v17 = vld [vmem:[%s2421_s4 + $0x38] sm:$0xff] }
  0xfb   :  { %1305 = vperm.xlu0 %1446, %v1182_v16   ;;  %v648_v16 = vld [vmem:[%s2421_s4 + $0x20] sm:$0xff] }
  0xfc   :  { %v408_v4 = vadd.f32 %v383_v62, %v204_v1  ;;  %v407_v5 = vadd.f32 %v382_v63, %v203_v21  ;;  %v656_v62 = vld [vmem:[%s2421_s4 + $0x60] sm:$0xff]  ;;  %v658_v1 = vld [vmem:[%s2421_s4 + $0x70] sm:$0xff] }
  0xfd   :  { %v535_v53 = vpop.permute.xlu1 %534  ;;  %v530_v54 = vpop.permute.xlu0 %529  ;;  %v688_v63 = vld [vmem:[%s2421_s4 + $0x160] sm:$0xff]  ;;  %v690_v21 = vld [vmem:[%s2421_s4 + $0x170] sm:$0xff] }
  0xfe   :  { %v1481_v55 = vpop.eup %1480  ;;  %v581_v56 = vadd.f32 %v535_v53, %v406_v51  ;;  %v580_v57 = vadd.f32 %v530_v54, %v405_v52  ;;  %v682_v51 = vld [vmem:[%s2421_s4 + $0x130] sm:$0xff]  ;;  %v653_v52 = vld [vmem:[%s2421_s4 + $0x48] sm:$0xff]  ;;  %v652_v54 = vld [vmem:[%s2421_s4 + $0x40] sm:$0xff] }
  0xff   :  { %v1483_v58 = vpop.eup %1482  ;;  %v685_v53 = vld [vmem:[%s2421_s4 + $0x148] sm:$0xff] }
 0x100   :  { %1484 = vtanh.f32 %v581_v56  ;;  %v1405_v59 = vpack.c.bf16 %v1481_v55, %v1483_v58  ;;  %v684_v55 = vld [vmem:[%s2421_s4 + $0x140] sm:$0xff]  ;;  %v655_v56 = vld [vmem:[%s2421_s4 + $0x58] sm:$0xff]  ;;  %v654_v58 = vld [vmem:[%s2421_s4 + $0x50] sm:$0xff] }
 0x101   :  { %1486 = vtanh.f32 %v580_v57  ;;  %v172_v60 = vpop.permute.xlu1 %171  ;;  %v167_v61 = vpop.permute.xlu0 %166  ;;  %v687_v57 = vld [vmem:[%s2421_s4 + $0x158] sm:$0xff] }
 0x102   :  { %1406 = vmatpush1.bf16.msra.mxu0 %v1405_v59  ;;  %1437 = vmatpush1.bf16.msra.mxu1 %v1405_v59  ;;  %v206_v9 = vmul.f32 %v1880_v32, %v172_v60  ;;  %v205_v10 = vmul.f32 %v1880_v32, %v167_v61  ;;  %v686_v59 = vld [vmem:[%s2421_s4 + $0x150] sm:$0xff]  ;;  %v657_v60 = vld [vmem:[%s2421_s4 + $0x68] sm:$0xff] }
 0x103   :  { %1407 = vmatprep.subr.bf16.mxu0 %v1573_v27  ;;  %1425 = vmatprep.subr.bf16.mxu1 %v1573_v27  ;;  %v689_v61 = vld [vmem:[%s2421_s4 + $0x168] sm:$0xff] }
 0x105   :  { %v351_v0 = vpop.permute.xlu1 %350  ;;  %v346_v20 = vpop.permute.xlu0 %345 }
 0x106   :  { %v385_v2 = vmul.f32 %v1875_v30, %v351_v0  ;;  %v384_v3 = vmul.f32 %v1875_v30, %v346_v20  ;;  %v659_v0 = vld [vmem:[%s2421_s4 + $0x78] sm:$0xff] }
 0x107   :  { %v691_v20 = vld [vmem:[%s2421_s4 + $0x178] sm:$0xff] }
 0x108   :  { %v410_v18 = vadd.f32 %v385_v2, %v206_v9  ;;  %v409_v19 = vadd.f32 %v384_v3, %v205_v10  ;;  %v661_v2 = vld [vmem:[%s2421_s4 + $0x88] sm:$0xff]  ;;  %v694_v9 = vld [vmem:[%s2421_s4 + $0x190] sm:$0xff] }
 0x109   :  { %v545_v6 = vpop.permute.xlu1 %544  ;;  %v540_v7 = vpop.permute.xlu0 %539  ;;  %v693_v3 = vld [vmem:[%s2421_s4 + $0x188] sm:$0xff] }
 0x10a   :  { %v1485_v8 = vpop.eup %1484  ;;  %v583_v11 = vadd.f32 %v545_v6, %v408_v4  ;;  %v582_v14 = vadd.f32 %v540_v7, %v407_v5  ;;  %v660_v4 = vld [vmem:[%s2421_s4 + $0x80] sm:$0xff]  ;;  %v663_v6 = vld [vmem:[%s2421_s4 + $0x98] sm:$0xff]  ;;  %v665_v10 = vld [vmem:[%s2421_s4 + $0xa8] sm:$0xff] }
 0x10b   :  { %v1487_v15 = vpop.eup %1486  ;;  %v692_v5 = vld [vmem:[%s2421_s4 + $0x180] sm:$0xff]  ;;  %v695_v7 = vld [vmem:[%s2421_s4 + $0x198] sm:$0xff] }
 0x10c   :  { %1488 = vtanh.f32 %v583_v11  ;;  %v1408_v22 = vpack.c.bf16 %v1485_v8, %v1487_v15  ;;  %v662_v8 = vld [vmem:[%s2421_s4 + $0x90] sm:$0xff]  ;;  %v697_v11 = vld [vmem:[%s2421_s4 + $0x1a8] sm:$0xff]  ;;  %v696_v15 = vld [vmem:[%s2421_s4 + $0x1a0] sm:$0xff] }
 0x10d   :  { %1490 = vtanh.f32 %v582_v14  ;;  %v555_v23 = vpop.permute.xlu1 %554  ;;  %v550_v26 = vpop.permute.xlu0 %549  ;;  %v664_v14 = vld [vmem:[%s2421_s4 + $0xa0] sm:$0xff] }
 0x10e   :  { %v585_v28 = vadd.f32 %v555_v23, %v410_v18  ;;  %v584_v24 = vadd.f32 %v550_v26, %v409_v19  ;;  %1409 = vmatpush1.bf16.msra.mxu0 %v1408_v22  ;;  %1438 = vmatpush1.bf16.msra.mxu1 %v1408_v22  ;;  %v667_v18 = vld [vmem:[%s2421_s4 + $0xb8] sm:$0xff]  ;;  %v666_v22 = vld [vmem:[%s2421_s4 + $0xb0] sm:$0xff]  ;;  %v669_v26 = vld [vmem:[%s2421_s4 + $0xc8] sm:$0xff] }
 0x10f   :  { %1410 = vmatprep.subr.bf16.mxu0 %v1573_v27  ;;  %1426 = vmatprep.subr.bf16.mxu1 %v1573_v27  ;;  %v699_v19 = vld [vmem:[%s2421_s4 + $0x1b8] sm:$0xff]  ;;  %v698_v23 = vld [vmem:[%s2421_s4 + $0x1b0] sm:$0xff] }
 0x110   :  { %1492 = vtanh.f32 %v585_v28  ;;  %v701_v28 = vld [vmem:[%s2421_s4 + $0x1c8] sm:$0xff] }
 0x111   :  { %1494 = vtanh.f32 %v584_v24  ;;  %v356_v25 = vpop.permute.xlu1 %355  ;;  %v177_v12 = vpop.permute.xlu0 %176  ;;  %v668_v24 = vld [vmem:[%s2421_s4 + $0xc0] sm:$0xff] }
 0x112   :  { %v386_v29 = vmul.f32 %v1875_v30, %v356_v25  ;;  %v207_v13 = vmul.f32 %v1880_v32, %v177_v12  ;;  %v1574_v30 = vmov 0.0   ;;  %v644_v32 = vld [vmem:[%s2421_s4] sm:$0xff]  ;;  %v671_v12 = vld [vmem:[%s2421_s4 + $0xd8] sm:$0xff] }
 0x113   :  { %v700_v25 = vld [vmem:[%s2421_s4 + $0x1c0] sm:$0xff] }
 0x114   :  { %v411_v31 = vadd.f32 %v386_v29, %v207_v13  ;;  %v703_v29 = vld [vmem:[%s2421_s4 + $0x1d8] sm:$0xff]  ;;  %v670_v13 = vld [vmem:[%s2421_s4 + $0xd0] sm:$0xff] }
 0x115   :  { %v560_v33 = vpop.permute.xlu0 %559 }
 0x116   :  { %v1489_v34 = vpop.eup %1488  ;;  %v586_v35 = vadd.f32 %v560_v33, %v411_v31  ;;  %v702_v31 = vld [vmem:[%s2421_s4 + $0x1d0] sm:$0xff]  ;;  %v673_v33 = vld [vmem:[%s2421_s4 + $0xe8] sm:$0xff] }
 0x117   :  { %v1491_v36 = vpop.eup %1490 }
 0x118   :  { %1496 = vtanh.f32 %v586_v35  ;;  %v1411_v37 = vpack.c.bf16 %v1489_v34, %v1491_v36  ;;  %v705_v34 = vld [vmem:[%s2421_s4 + $0x1e8] sm:$0xff]  ;;  %v672_v35 = vld [vmem:[%s2421_s4 + $0xe0] sm:$0xff] }
 0x119   :  { %v704_v36 = vld [vmem:[%s2421_s4 + $0x1e0] sm:$0xff] }
 0x11a   :  { %v1493_v38 = vpop.eup %1492  ;;  %1412 = vmatpush1.bf16.msra.mxu0 %v1411_v37  ;;  %1439 = vmatpush1.bf16.msra.mxu1 %v1411_v37  ;;  %v675_v37 = vld [vmem:[%s2421_s4 + $0xf8] sm:$0xff] }
 0x11b   :  { %v1495_v39 = vpop.eup %1494  ;;  %1413 = vmatprep.subr.bf16.mxu0 %v1573_v27  ;;  %1427 = vmatprep.subr.bf16.mxu1 %v1573_v27  ;;  %v679_v27 = vld [vmem:[%s2421_s4 + $0x118] sm:$0xff] }
 0x11c   :  { %v1414_v40 = vpack.c.bf16 %v1493_v38, %v1495_v39  ;;  %v707_v38 = vld [vmem:[%s2421_s4 + $0x1f8] sm:$0xff]  ;;  %v674_v39 = vld [vmem:[%s2421_s4 + $0xf0] sm:$0xff] }
 0x11e   :  { %1415 = vmatpush1.bf16.msra.mxu0 %v1414_v40  ;;  %1440 = vmatpush1.bf16.msra.mxu1 %v1414_v40  ;;  %v706_v40 = vld [vmem:[%s2421_s4 + $0x1f0] sm:$0xff]  ;;  %s1575_s4 = smov [#allocation3]  }
 0x11f   :  { %788 = vmatprep.subr.mxu0 %v1574_v30  ;;  %1428 = vmatprep.subr.mxu1 %v1574_v30  ;;  %v986_v30 = vpop.permute.xlu1 %985  ;;  %s1370_s17 = sshll.u32 %s1575_s4, 4  ;;  %s1371_s17 = int_to_ptr.vmem [resolvable:$true] %s1370_s17 }
 0x120   :  { %s1548_s18 = scalar_lea.vmem %s1371_s17, 16  ;;  %s1552_s3 = scalar_lea.vmem %s1371_s17, 32 }
 0x121   :  { %p1549_p0 = scmp.ne.s32.totalorder %s1371_s17, %s1548_s18  ;;  %p1553_p1 = scmp.lt.s32.totalorder %s1371_s17, %s1371_s17 }
 0x122   :  { %v1497_v42 = vpop.eup %1496  ;;  %p1554_p2 = scmp.lt.s32.totalorder %s1552_s3, %s1548_s18 }
 0x123   :  { %789 = vmatpush1.msra.mxu0 %v1497_v42  ;;  %1441 = vmatpush1.msra.mxu1 %v1497_v42 }
 0x124   :  { %805 = vmatmul.mubr.f32.vlgmr.msra.gmra.mrb[0].mxu0 %v644_v32  ;;  %885 = vmatmul.mubr.f32.vlgmr.msra.gmra.mrb[0].mxu1 %v676_v41  ;;  %v991_v32 = vpop.permute.xlu0 %990  ;;  %v996_v41 = vpop.permute.xlu1 %995  ;;  %p1555_p3 = por %p1554_p2, %p1553_p1 }
 0x125   :  { %809 = vmatprep.mubr.f32.mxu0 %v647_v43  ;;  %889 = vmatprep.mubr.f32.mxu1 %v679_v27 }
 0x126   :  { %p1556_p4 = pnand %p1555_p3, %p1549_p0 }
 0x128   :  { %810 = vmatmul.mubr.f32.gmra.mrb[2].mxu0 %v646_v44  ;;  %890 = vmatmul.mubr.f32.gmra.mrb[2].mxu1 %v678_v45  ;;  %v1001_v42 = vpop.permute.xlu0 %1000  ;;  %v1006_v43 = vpop.permute.xlu1 %1005 }
 0x129   :  { %814 = vmatprep.mubr.f32.mxu0 %v649_v46  ;;  %894 = vmatprep.mubr.f32.mxu1 %v681_v47 }
 0x12c   :  { %815 = vmatmul.mubr.f32.gmra.mrb[4].mxu0 %v648_v16  ;;  %895 = vmatmul.mubr.f32.gmra.mrb[4].mxu1 %v680_v48  ;;  %v2297_v27 = vpop.permute.xlu0 %1010  ;;  %v2299_v44 = vpop.permute.xlu1 %1015 }
 0x12d   :  { %819 = vmatprep.mubr.f32.mxu0 %v651_v17  ;;  %899 = vmatprep.mubr.f32.mxu1 %v683_v49 }
 0x130   :  { %820 = vmatmul.mubr.f32.gmra.mrb[6].mxu0 %v650_v50  ;;  %900 = vmatmul.mubr.f32.gmra.mrb[6].mxu1 %v682_v51  ;;  %v2301_v45 = vpop.permute.xlu0 %1020  ;;  %v2303_v46 = vpop.permute.xlu1 %1025 }
 0x131   :  { %824 = vmatprep.mubr.f32.mxu0 %v653_v52  ;;  %904 = vmatprep.mubr.f32.mxu1 %v685_v53 }
 0x134   :  { %825 = vmatmul.mubr.f32.gmra.mrb[8].mxu0 %v652_v54  ;;  %905 = vmatmul.mubr.f32.gmra.mrb[8].mxu1 %v684_v55  ;;  %v2305_v47 = vpop.permute.xlu0 %1030  ;;  %v2307_v16 = vpop.permute.xlu1 %1035 }
 0x135   :  { %829 = vmatprep.mubr.f32.mxu0 %v655_v56  ;;  %909 = vmatprep.mubr.f32.mxu1 %v687_v57 }
 0x138   :  { %830 = vmatmul.mubr.f32.gmra.mrb[10].mxu0 %v654_v58  ;;  %910 = vmatmul.mubr.f32.gmra.mrb[10].mxu1 %v686_v59  ;;  %v2309_v48 = vpop.permute.xlu0 %1040  ;;  %v2311_v17 = vpop.permute.xlu1 %1045 }
 0x139   :  { %834 = vmatprep.mubr.f32.mxu0 %v657_v60  ;;  %914 = vmatprep.mubr.f32.mxu1 %v689_v61 }
 0x13c   :  { %835 = vmatmul.mubr.f32.gmra.mrb[12].mxu0 %v656_v62  ;;  %915 = vmatmul.mubr.f32.gmra.mrb[12].mxu1 %v688_v63  ;;  %v2313_v49 = vpop.permute.xlu0 %1050  ;;  %v2315_v50 = vpop.permute.xlu1 %1055 }
 0x13d   :  { %839 = vmatprep.mubr.f32.mxu0 %v659_v0  ;;  %919 = vmatprep.mubr.f32.mxu1 %v691_v20 }
 0x140   :  { %840 = vmatmul.mubr.f32.gmra.mrb[14].mxu0 %v658_v1  ;;  %920 = vmatmul.mubr.f32.gmra.mrb[14].mxu1 %v690_v21  ;;  %v2317_v51 = vpop.permute.xlu0 %1060  ;;  %v2319_v52 = vpop.permute.xlu1 %1065 }
 0x141   :  { %844 = vmatprep.mubr.f32.mxu0 %v661_v2  ;;  %924 = vmatprep.mubr.f32.mxu1 %v693_v3 }
 0x144   :  { %845 = vmatmul.mubr.f32.gmra.mrb[16].mxu0 %v660_v4  ;;  %925 = vmatmul.mubr.f32.gmra.mrb[16].mxu1 %v692_v5  ;;  %v2321_v53 = vpop.permute.xlu0 %1070  ;;  %v1186_v54 = vpop.permute.xlu1 %1185 }
 0x145   :  { %849 = vmatprep.mubr.f32.mxu0 %v663_v6  ;;  %929 = vmatprep.mubr.f32.mxu1 %v695_v7 }
 0x148   :  { %850 = vmatmul.mubr.f32.gmra.mrb[18].mxu0 %v662_v8  ;;  %930 = vmatmul.mubr.f32.gmra.mrb[18].mxu1 %v694_v9  ;;  %v1191_v55 = vpop.permute.xlu0 %1190  ;;  %v1196_v56 = vpop.permute.xlu1 %1195 }
 0x149   :  { %854 = vmatprep.mubr.f32.mxu0 %v665_v10  ;;  %933 = vmatprep.mubr.f32.mxu1 %v697_v11 }
 0x14c   :  { %855 = vmatmul.mubr.f32.gmra.mrb[20].mxu0 %v664_v14  ;;  %934 = vmatmul.mubr.f32.gmra.mrb[20].mxu1 %v696_v15  ;;  %v1201_v57 = vpop.permute.xlu0 %1200  ;;  %v2323_v58 = vpop.permute.xlu1 %1205 }
 0x14d   :  { %859 = vmatprep.mubr.f32.mxu0 %v667_v18  ;;  %937 = vmatprep.mubr.f32.mxu1 %v699_v19 }
 0x150   :  { %860 = vmatmul.mubr.f32.gmra.mrb[22].mxu0 %v666_v22  ;;  %938 = vmatmul.mubr.f32.gmra.mrb[22].mxu1 %v698_v23  ;;  %v2325_v59 = vpop.permute.xlu0 %1210  ;;  %v2329_v20 = vpop.permute.xlu1 %1215 }
 0x151   :  { %864 = vmatprep.mubr.f32.mxu0 %v669_v26  ;;  %941 = vmatprep.mubr.f32.mxu1 %v701_v28 }
 0x154   :  { %865 = vmatmul.mubr.f32.gmra.mrb[24].mxu0 %v668_v24  ;;  %942 = vmatmul.mubr.f32.gmra.mrb[24].mxu1 %v700_v25  ;;  %v2331_v1 = vpop.permute.xlu0 %1220  ;;  %v2337_v11 = vpop.permute.xlu1 %1225 }
 0x155   :  { %869 = vmatprep.mubr.f32.mxu0 %v671_v12  ;;  %945 = vmatprep.mubr.f32.mxu1 %v703_v29 }
 0x158   :  { %870 = vmatmul.mubr.f32.gmra.mrb[26].mxu0 %v670_v13  ;;  %946 = vmatmul.mubr.f32.gmra.mrb[26].mxu1 %v702_v31  ;;  %v2339_v14 = vpop.permute.xlu0 %1230 }
 0x159   :  { %874 = vmatprep.mubr.f32.mxu0 %v673_v33  ;;  %949 = vmatprep.mubr.f32.mxu1 %v705_v34  ;;  %v2345_v34 = vpop.permute.xlu1 %1235 }
 0x15c   :  { %875 = vmatmul.mubr.f32.gmra.mrb[28].mxu0 %v672_v35  ;;  %950 = vmatmul.mubr.f32.gmra.mrb[28].mxu1 %v704_v36  ;;  %v2347_v35 = vpop.permute.xlu0 %1240 }
 0x15d   :  { %879 = vmatprep.mubr.f32.mxu0 %v675_v37  ;;  %953 = vmatprep.mubr.f32.mxu1 %v707_v38 }
 0x160   :  { %880 = vmatmul.mubr.f32.gmra.mrb[30].mxu0 %v674_v39  ;;  %954 = vmatmul.mubr.f32.gmra.mrb[30].mxu1 %v706_v40 }
 0x1f7   :  { %v806_v60 = vpop.f32.mrb[0].mxu0  ;;  %v2327_v61 = vpop.f32.mrb[0].mxu1 }
 0x1f8   :  { %v1108_v62 = vadd.f32 %v986_v30, %v806_v60  ;;  %v808_v63 = vpop.f32.mrb[1].mxu0  ;;  %v888_v0 = vpop.f32.mrb[1].mxu1 }
 0x1fa   :  { %1498 = vtanh.f32 %v1108_v62 }
 0x1fb   :  { %v811_v21 = vpop.f32.mrb[2].mxu0  ;;  %v2333_v2 = vpop.f32.mrb[2].mxu1 }
 0x1fc   :  { %v1109_v3 = vadd.f32 %v991_v32, %v811_v21  ;;  %v813_v4 = vpop.f32.mrb[3].mxu0  ;;  %v893_v5 = vpop.f32.mrb[3].mxu1 }
 0x1fd   :  { %v2355_v21 = vpop.permute.xlu1 %1075 }
 0x1fe   :  { %1500 = vtanh.f32 %v1109_v3  ;;  %v2357_v3 = vpop.permute.xlu0 %1245 }
 0x1ff   :  { %v816_v6 = vpop.f32.mrb[4].mxu0  ;;  %v2335_v7 = vpop.f32.mrb[4].mxu1 }
 0x200   :  { %v1110_v8 = vadd.f32 %v996_v41, %v816_v6  ;;  %v818_v9 = vpop.f32.mrb[5].mxu0  ;;  %v898_v10 = vpop.f32.mrb[5].mxu1 }
 0x202   :  { %1502 = vtanh.f32 %v1110_v8 }
 0x203   :  { %v821_v15 = vpop.f32.mrb[6].mxu0  ;;  %v2341_v18 = vpop.f32.mrb[6].mxu1 }
 0x204   :  { %v1111_v19 = vadd.f32 %v1001_v42, %v821_v15  ;;  %v823_v22 = vpop.f32.mrb[7].mxu0  ;;  %v903_v23 = vpop.f32.mrb[7].mxu1 }
 0x205   :  { %v1499_v26 = vpop.eup %1498 }
 0x206   :  { %1504 = vtanh.f32 %v1111_v19  ;;  %v1308_v31 = vmul.f32 %v1499_v26, %v1186_v54 }
 0x207   :  { %v826_v28 = vpop.f32.mrb[8].mxu0  ;;  %v2343_v24 = vpop.f32.mrb[8].mxu1 }
 0x208   :  { %v1501_v25 = vpop.eup %1500  ;;  %v1112_v12 = vadd.f32 %v1006_v43, %v826_v28  ;;  %v828_v29 = vpop.f32.mrb[9].mxu0 }
 0x209   :  { %v908_v13 = vpop.f32.mrb[9].mxu1  ;;  %v1309_v33 = vmul.f32 %v1501_v25, %v1191_v55  ;;  %v2367_v25 = vpop.permute.xlu1 %1080 }
 0x20a   :  { %1506 = vtanh.f32 %v1112_v12  ;;  %v2369_v12 = vpop.permute.xlu0 %1250 }
 0x20b   :  { %v1333_v36 = vadd.f32 %v1309_v33, %v1308_v31  ;;  %v831_v37 = vpop.f32.mrb[10].mxu0  ;;  %v2349_v38 = vpop.f32.mrb[10].mxu1 }
 0x20c   :  { %v1503_v39 = vpop.eup %1502  ;;  %v1113_v40 = vadd.f32 %v2297_v27, %v831_v37  ;;  %v833_v30 = vpop.f32.mrb[11].mxu0 }
 0x20d   :  { %v913_v32 = vpop.f32.mrb[11].mxu1  ;;  %v1310_v41 = vmul.f32 %v1503_v39, %v1196_v56 }
 0x20e   :  { %1508 = vtanh.f32 %v1113_v40 }
 0x20f   :  { %v1334_v42 = vadd.f32 %v1333_v36, %v1310_v41  ;;  %v836_v43 = vpop.f32.mrb[12].mxu0  ;;  %v2352_v54 = vpop.f32.mrb[12].mxu1 }
 0x210   :  { %v1505_v55 = vpop.eup %1504  ;;  %v1114_v60 = vadd.f32 %v2299_v44, %v836_v43  ;;  %v838_v62 = vpop.f32.mrb[13].mxu0 }
 0x211   :  { %v918_v63 = vpop.f32.mrb[13].mxu1  ;;  %v1311_v0 = vmul.f32 %v1505_v55, %v1201_v57  ;;  %v2375_v43 = vpop.permute.xlu1 %1085 }
 0x212   :  { %1510 = vtanh.f32 %v1114_v60  ;;  %v2377_v55 = vpop.permute.xlu0 %1255 }
 0x213   :  { %v1335_v27 = vadd.f32 %v1334_v42, %v1311_v0  ;;  %v841_v4 = vpop.f32.mrb[14].mxu0  ;;  %v2359_v5 = vpop.f32.mrb[14].mxu1 }
 0x214   :  { %v1507_v56 = vpop.eup %1506  ;;  %v1115_v6 = vadd.f32 %v2301_v45, %v841_v4  ;;  %v843_v8 = vpop.f32.mrb[15].mxu0 }
 0x215   :  { %v923_v9 = vpop.f32.mrb[15].mxu1  ;;  %v1312_v10 = vmul.f32 %v1507_v56, %v2323_v58 }
 0x216   :  { %1512 = vtanh.f32 %v1115_v6 }
 0x217   :  { %v1336_v44 = vadd.f32 %v1335_v27, %v1312_v10  ;;  %v846_v15 = vpop.f32.mrb[16].mxu0  ;;  %v2363_v57 = vpop.f32.mrb[16].mxu1 }
 0x218   :  { %v1509_v19 = vpop.eup %1508  ;;  %v1116_v22 = vadd.f32 %v2303_v46, %v846_v15  ;;  %v848_v23 = vpop.f32.mrb[17].mxu0 }
 0x219   :  { %v928_v26 = vpop.f32.mrb[17].mxu1  ;;  %v1313_v28 = vmul.f32 %v1509_v19, %v2325_v59  ;;  %v1091_v15 = vpop.permute.xlu1 %1090 }
 0x21a   :  { %1514 = vtanh.f32 %v1116_v22  ;;  %v1261_v19 = vpop.permute.xlu0 %1260 }
 0x21b   :  { %v1337_v45 = vadd.f32 %v1336_v44, %v1313_v28  ;;  %v851_v29 = vpop.f32.mrb[18].mxu0  ;;  %v931_v58 = vpop.f32.mrb[18].mxu1 }
 0x21c   :  { %v1511_v13 = vpop.eup %1510  ;;  %v1117_v31 = vadd.f32 %v2305_v47, %v851_v29  ;;  %v853_v33 = vpop.f32.mrb[19].mxu0 }
 0x21d   :  { %v932_v36 = vpop.f32.mrb[19].mxu1  ;;  %v1314_v37 = vmul.f32 %v1511_v13, %v2329_v20 }
 0x21e   :  { %1516 = vtanh.f32 %v1117_v31 }
 0x21f   :  { %v1338_v46 = vadd.f32 %v1337_v45, %v1314_v37  ;;  %v856_v39 = vpop.f32.mrb[20].mxu0  ;;  %v935_v40 = vpop.f32.mrb[20].mxu1  ;;  %v1124_v37 = vadd.f32 %v2319_v52, %v2327_v61  ;;  %v1126_v52 = vadd.f32 %v2355_v21, %v2335_v7  ;;  %v1129_v7 = vadd.f32 %v1091_v15, %v2349_v38 }
 0x220   :  { %v1513_v59 = vpop.eup %1512  ;;  %v1118_v30 = vadd.f32 %v2307_v16, %v856_v39  ;;  %v858_v32 = vpop.f32.mrb[21].mxu0 }
 0x221   :  { %v936_v41 = vpop.f32.mrb[21].mxu1  ;;  %v1315_v42 = vmul.f32 %v1513_v59, %v2331_v1  ;;  %v1096_v39 = vpop.permute.xlu1 %1095  ;;  %v1125_v32 = vadd.f32 %v2321_v53, %v2333_v2 }
 0x222   :  { %1518 = vtanh.f32 %v1118_v30 }
 0x223   :  { %v1339_v47 = vadd.f32 %v1338_v46, %v1315_v42  ;;  %v861_v60 = vpop.f32.mrb[22].mxu0  ;;  %v939_v62 = vpop.f32.mrb[22].mxu1 }
 0x224   :  { %v1515_v20 = vpop.eup %1514  ;;  %v1119_v63 = vadd.f32 %v2309_v48, %v861_v60  ;;  %v863_v0 = vpop.f32.mrb[23].mxu0  ;;  %v1127_v62 = vadd.f32 %v2367_v25, %v2341_v18 }
 0x225   :  { %v940_v27 = vpop.f32.mrb[23].mxu1  ;;  %v1316_v4 = vmul.f32 %v1515_v20, %v2337_v11  ;;  %v1101_v60 = vpop.permute.xlu1 %1100  ;;  %v1130_v0 = vadd.f32 %v1096_v39, %v2352_v54 }
 0x226   :  { %1520 = vtanh.f32 %v1119_v63 }
 0x227   :  { %v1340_v16 = vadd.f32 %v1339_v47, %v1316_v4  ;;  %v866_v56 = vpop.f32.mrb[24].mxu0  ;;  %v943_v6 = vpop.f32.mrb[24].mxu1  ;;  %v1131_v4 = vadd.f32 %v1101_v60, %v2359_v5 }
 0x228   :  { %v1517_v1 = vpop.eup %1516  ;;  %v1120_v8 = vadd.f32 %v2311_v17, %v866_v56  ;;  %v868_v9 = vpop.f32.mrb[25].mxu0 }
 0x229   :  { %v944_v10 = vpop.f32.mrb[25].mxu1  ;;  %v1317_v44 = vmul.f32 %v1517_v1, %v2339_v14  ;;  %v1106_v63 = vpop.permute.xlu1 %1105 }
 0x22a   :  { %1522 = vtanh.f32 %v1120_v8 }
 0x22b   :  { %v1341_v22 = vadd.f32 %v1340_v16, %v1317_v44  ;;  %v871_v48 = vpop.f32.mrb[26].mxu0  ;;  %v947_v23 = vpop.f32.mrb[26].mxu1 }
 0x22c   :  { %v1519_v26 = vpop.eup %1518  ;;  %v1121_v11 = vadd.f32 %v2313_v49, %v871_v48  ;;  %v873_v28 = vpop.f32.mrb[27].mxu0 }
 0x22d   :  { %v948_v45 = vpop.f32.mrb[27].mxu1  ;;  %v1318_v29 = vmul.f32 %v1519_v26, %v2345_v34  ;;  %v1266_v49 = vpop.permute.xlu0 %1265 }
 0x22e   :  { %1524 = vtanh.f32 %v1121_v11 }
 0x22f   :  { %v1342_v58 = vadd.f32 %v1341_v22, %v1318_v29  ;;  %v876_v17 = vpop.f32.mrb[28].mxu0  ;;  %v951_v13 = vpop.f32.mrb[28].mxu1 }
 0x230   :  { %v1521_v31 = vpop.eup %1520  ;;  %v1122_v14 = vadd.f32 %v2315_v50, %v876_v17  ;;  %v878_v33 = vpop.f32.mrb[29].mxu0 }
 0x231   :  { %v952_v36 = vpop.f32.mrb[29].mxu1  ;;  %v1319_v46 = vmul.f32 %v1521_v31, %v2347_v35  ;;  %v1271_v2 = vpop.permute.xlu0 %1270 }
 0x232   :  { %1526 = vtanh.f32 %v1122_v14 }
 0x233   :  { %v1343_v40 = vadd.f32 %v1342_v58, %v1319_v46  ;;  %v881_v59 = vpop.f32.mrb[30].mxu0  ;;  %v955_v34 = vpop.f32.mrb[30].mxu1  ;;  %1528 = vtanh.f32 %v1124_v37 }
 0x234   :  { %v1523_v30 = vpop.eup %1522  ;;  %v1123_v41 = vadd.f32 %v2317_v51, %v881_v59  ;;  %v883_v50 = vpop.f32.mrb[31].mxu0  ;;  %v1128_v51 = vadd.f32 %v2375_v43, %v2343_v24  ;;  %v1132_v43 = vadd.f32 %v1106_v63, %v2363_v57 }
 0x235   :  { %v956_v42 = vpop.f32.mrb[31].mxu1  ;;  %v1320_v47 = vmul.f32 %v1523_v30, %v2357_v3 }
 0x236   :  { %1530 = vtanh.f32 %v1123_v41 }
 0x237   :  { %v1344_v61 = vadd.f32 %v1343_v40, %v1320_v47  ;;  %1532 = vtanh.f32 %v1125_v32 }
 0x238   :  { %v1525_v35 = vpop.eup %1524  ;;  %1534 = vtanh.f32 %v1126_v52 }
 0x239   :  { %v1321_v53 = vmul.f32 %v1525_v35, %v2369_v12  ;;  %1536 = vtanh.f32 %v1127_v62  ;;  %v1276_v12 = vpop.permute.xlu0 %1275 }
 0x23a   :  { %1538 = vtanh.f32 %v1128_v51 }
 0x23b   :  { %v1345_v20 = vadd.f32 %v1344_v61, %v1321_v53  ;;  %1540 = vtanh.f32 %v1129_v7 }
 0x23c   :  { %v1527_v3 = vpop.eup %1526  ;;  %1542 = vtanh.f32 %v1130_v0 }
 0x23d   :  { %v1322_v21 = vmul.f32 %v1527_v3, %v2377_v55  ;;  %v1529_v27 = vpop.eup %1528  ;;  %v1281_v55 = vpop.permute.xlu1 %1280  ;;  %1544 = vtanh.f32 %v1131_v4 }
 0x23e   :  { %v1324_v56 = vmul.f32 %v1529_v27, %v1266_v49  ;;  %v1286_v9 = vpop.permute.xlu0 %1285  ;;  %1546 = vtanh.f32 %v1132_v43 }
 0x23f   :  { %v1346_v18 = vadd.f32 %v1345_v20, %v1322_v21 }
 0x240   :  { %v1531_v25 = vpop.eup %1530 }
 0x241   :  { %v1323_v16 = vmul.f32 %v1531_v25, %v1261_v19  ;;  %v1533_v24 = vpop.eup %1532  ;;  %v1291_v48 = vpop.permute.xlu1 %1290 }
 0x242   :  { %v1535_v6 = vpop.eup %1534  ;;  %v1325_v1 = vmul.f32 %v1533_v24, %v1271_v2  ;;  %v1296_v11 = vpop.permute.xlu0 %1295 }
 0x243   :  { %v1347_v38 = vadd.f32 %v1346_v18, %v1323_v16  ;;  %v1537_v54 = vpop.eup %1536  ;;  %v1326_v10 = vmul.f32 %v1535_v6, %v1276_v12 }
 0x244   :  { %v1539_v15 = vpop.eup %1538  ;;  %v1327_v22 = vmul.f32 %v1537_v54, %v1281_v55 }
 0x245   :  { %v1348_v8 = vadd.f32 %v1347_v38, %v1324_v56  ;;  %v1541_v19 = vpop.eup %1540  ;;  %v1328_v23 = vmul.f32 %v1539_v15, %v1286_v9  ;;  %v1301_v31 = vpop.permute.xlu1 %1300 }
 0x246   :  { %v1543_v57 = vpop.eup %1542  ;;  %v1329_v28 = vmul.f32 %v1541_v19, %v1291_v48  ;;  %v1306_v36 = vpop.permute.xlu0 %1305 }
 0x247   :  { %v1349_v44 = vadd.f32 %v1348_v8, %v1325_v1  ;;  %v1545_v29 = vpop.eup %1544  ;;  %v1330_v58 = vmul.f32 %v1543_v57, %v1296_v11 }
 0x248   :  { %v1547_v13 = vpop.eup %1546  ;;  %v1331_v14 = vmul.f32 %v1545_v29, %v1301_v31 }
 0x249   :  { %v1350_v5 = vadd.f32 %v1349_v44, %v1326_v10  ;;  %v1332_v37 = vmul.f32 %v1547_v13, %v1306_v36 }
 0x24b   :  { %v1351_v26 = vadd.f32 %v1350_v5, %v1327_v22 }
 0x24d   :  { %v1352_v45 = vadd.f32 %v1351_v26, %v1328_v23 }
 0x24f   :  { %v1353_v17 = vadd.f32 %v1352_v45, %v1329_v28 }
 0x251   :  { %v1354_v33 = vadd.f32 %v1353_v17, %v1330_v58 }
 0x253   :  { %v1355_v46 = vadd.f32 %v1354_v33, %v1331_v14 }
 0x255   :  { %v1356_v39 = vadd.f32 %v1355_v46, %v1332_v37 }
 0x257   :  { %v1357_v49 = vrot.slane %v1356_v39, 4 }
 0x259   :  { %v1358_v40 = vadd.f32 %v1357_v49, %v1356_v39 }
 0x25b   :  { %v1359_v59 = vrot.slane %v1358_v40, 2 }
 0x25d   :  { %v1360_v34 = vadd.f32 %v1359_v59, %v1358_v40 }
 0x25f   :  { %v1361_v30 = vrot.slane %v1360_v34, 1 }
 0x261   :  { %v1362_v32 = vadd.f32 %v1361_v30, %v1360_v34 }
 0x263   :  { %1363 = vst [vmem:[#allocation3] sm:$0x1] %v1362_v32 }
 0x264   :  { %1559 = shalt.err (!%p1556_p4)
}
 0x265   :  { %s1560_s21 = scalar_lea.hbm %s2424_s7, 16 }
 0x266   :  { %p1561_p5 = scmp.ne.s32.totalorder %s2424_s7, %s1560_s21  ;;  %p1564_p6 = scmp.lt.u32.totalorder %s1560_s21, %s2424_s7 }
 0x268   :  { %p1566_p7 = pnand %p1564_p6, %p1561_p5 }
 0x26a   :  { %1569 = shalt.err (!%p1566_p7)
}
 0x26b   :  { %1373 = dma.vmem_to_hbm [thread:$0]  %s1371_s17, 16, %s2424_s7, [#allocation4]  }
 0x26c   :  { %1570 = dma.done.wait [#allocation4], 16  }
 0x26d   :  { %1571 = vsyncadd [#allocation4], 4294967280 }
 0x26e   :  { %1377 = vsyncpa [#allocation4], 1 }

</bundles_post_ra>
